<compile_context>
chip_gen: v5e
topology: v5e:2x2
jax: 0.10.0
libtpu: 0.0.40
codegen_flags: <defaults>
</compile_context>

<pallas_src>
from functools import partial

import jax
import jax.numpy as jnp
import numpy as np
from jax import lax
from jax.experimental import pallas as pl
from jax.experimental.pallas import tpu as pltpu


def _round_up(x, m):
    return (x + m - 1) // m * m


def _vmem_capacity_bytes():
    """Physical VMEM of the local TPU; conservative fallback if unavailable."""
    try:
        return int(pltpu.get_tpu_info().vmem_capacity_bytes)
    except Exception:
        return 64 << 20  # v7x per-TC size; safe lower bound everywhere


def _const_spec(shape):
    """BlockSpec for inputs whose block index is (0, 0) on every grid step.

    A double buffer is pure VMEM waste for these, so request a single buffer
    when this Pallas version supports `pipeline_mode`.
    """
    try:
        return pl.BlockSpec(shape, lambda i, j: (0, 0),
                            pipeline_mode=pl.Buffered(1))
    except TypeError:  # older signature without pipeline_mode
        return pl.BlockSpec(shape, lambda i, j: (0, 0))


def _tile_vmem_bytes(tm, tv, H, x_it, w_it, y_it, out_it):
    """Approximate VMEM working set for one grid step (with pipelining)."""
    return (2 * tm * H * x_it        # x row tile, double-buffered
            + 2 * H * tv * w_it      # decoder weight tile, double-buffered
            + 2 * tv * w_it          # decoder bias tile, double-buffered
            + 2 * tm * tv * out_it   # logits tile, double-buffered
            + H * H * w_it           # dense weight, single-buffered (Buffered(1))
            + 3 * H * w_it           # dense bias + LN gamma + LN beta
            + tm * H * y_it)         # transformed-rows scratch


# ---------------------------------------------------------------------------
# Fused kernel: transform once per row tile (j == 0), then decoder matmul +
# bias for every vocab tile j of that row tile.
# ---------------------------------------------------------------------------
def _fused_head_kernel(x_ref, dw_ref, db_ref, g_ref, beta_ref,
                       decw_ref, bias_ref, o_ref, y_ref, *, eps):
    j = pl.program_id(1)

    @pl.when(j == 0)
    def _():
        # dense(H->H) + exact erf-GELU + LayerNorm, all in an f32 epilogue.
        h = jnp.dot(x_ref[...], dw_ref[...],
                    preferred_element_type=jnp.float32)            # (tm, H) f32
        h = h + db_ref[...].astype(jnp.float32)

        inv_sqrt2 = jnp.float32(0.7071067811865476)
        h = 0.5 * h * (1.0 + lax.erf(h * inv_sqrt2))               # exact GELU

        mu = jnp.mean(h, axis=-1, keepdims=True)
        var = jnp.mean(jnp.square(h - mu), axis=-1, keepdims=True)
        hn = (h - mu) * lax.rsqrt(var + jnp.float32(eps))
        y = hn * g_ref[...].astype(jnp.float32) + beta_ref[...].astype(jnp.float32)

        y_ref[...] = y.astype(y_ref.dtype)                         # stays in VMEM

    # decoder: (tm, H) @ (H, tv) + bias, f32 accumulation on the MXU.
    out = jnp.dot(y_ref[...], decw_ref[...],
                  preferred_element_type=jnp.float32)
    out = out + bias_ref[...].astype(jnp.float32)
    o_ref[...] = out.astype(o_ref.dtype)


# ---------------------------------------------------------------------------
# Wrapper
# ---------------------------------------------------------------------------
def bert_lm_prediction_head(x, params, *, eps=1e-12, tm=None, tv=512,
                            out_dtype=jnp.float32):
    B, S, H = x.shape
    V = params["dec_w"].shape[1]
    M = B * S

    x_it = x.dtype.itemsize
    w_it = params["dec_w"].dtype.itemsize
    out_it = jnp.dtype(out_dtype).itemsize
    # Transformed rows are held in the decoder-weight dtype: bf16 weights give
    # a bf16 x bf16 MXU matmul with f32 accumulation.
    y_dtype = params["dec_w"].dtype
    y_it = jnp.dtype(y_dtype).itemsize

    vmem_phys = _vmem_capacity_bytes()
    vmem_budget = int(vmem_phys * 0.70)

    # Vocab tile: keep (8, 128) alignment; clamp to the padded vocab.
    tv = min(tv, _round_up(V, 128))
    tv = _round_up(tv, 128)
    Vp = _round_up(V, tv)

    # Row tile: big tm = decoder-weight reuse.  Pick per generation from VMEM
    # size, then shrink until the tile working set fits the budget.
    if tm is None:
        tm = 1024 if vmem_phys >= (96 << 20) else 512   # v5e/v6e vs v7x
    tm = min(tm, _round_up(M, 8))
    tm = max(8, _round_up(tm, 8))
    while tm > 8 and _tile_vmem_bytes(tm, tv, H, x_it, w_it, y_it, out_it) > vmem_budget:
        tm = max(8, _round_up(tm // 2, 8))
    Mp = _round_up(M, tm)

    tile_bytes = _tile_vmem_bytes(tm, tv, H, x_it, w_it, y_it, out_it)
    vmem_limit = max(16 << 20, min(int(tile_bytes * 1.4) + (4 << 20), vmem_budget))

    xf = x.reshape(M, H)
    if Mp != M:
        xf = jnp.pad(xf, ((0, Mp - M), (0, 0)))

    # NOTE: production callers should pre-pad dec_w / dec_bias to a multiple of
    # tv once at weight-prep time so this per-call copy of the full (H, V)
    # weight never runs.  It is skipped entirely when V % tv == 0.
    dec_w = params["dec_w"]
    dec_bias = params["dec_bias"]
    if Vp != V:
        dec_w = jnp.pad(dec_w, ((0, 0), (0, Vp - V)))
        dec_bias = jnp.pad(dec_bias, ((0, 0), (0, Vp - V)))

    grid = (Mp // tm, Vp // tv)

    cost = pl.CostEstimate(
        flops=int(2 * Mp * H * H + 2 * Mp * H * Vp),
        transcendentals=int(Mp * H),
        bytes_accessed=int(
            Mp * H * x_it
            + H * H * w_it
            + H * Vp * w_it * grid[0]     # decoder weight streamed per row tile
            + Mp * Vp * out_it
        ),
    )

    logits = pl.pallas_call(
        partial(_fused_head_kernel, eps=eps),
        out_shape=jax.ShapeDtypeStruct((Mp, Vp), out_dtype),
        grid_spec=pltpu.PrefetchScalarGridSpec(
            num_scalar_prefetch=0,
            grid=grid,
            in_specs=[
                pl.BlockSpec((tm, H), lambda i, j: (i, 0)),   # x rows (resident over j)
                _const_spec((H, H)),                          # dense weight
                _const_spec((1, H)),                          # dense bias
                _const_spec((1, H)),                          # LN gamma
                _const_spec((1, H)),                          # LN beta
                pl.BlockSpec((H, tv), lambda i, j: (0, j)),   # decoder weight (H, V)
                pl.BlockSpec((1, tv), lambda i, j: (0, j)),   # decoder bias
            ],
            out_specs=pl.BlockSpec((tm, tv), lambda i, j: (i, j)),
            scratch_shapes=[pltpu.VMEM((tm, H), y_dtype)],    # transformed rows
        ),
        compiler_params=pltpu.CompilerParams(
            dimension_semantics=("parallel", "arbitrary"),
            vmem_limit_bytes=int(vmem_limit),
        ),
        cost_estimate=cost,
    )(xf, params["dense_w"], params["dense_b"], params["ln_g"],
      params["ln_b"], dec_w, dec_bias)

    if Mp != M or Vp != V:
        logits = logits[:M, :V]
    return logits.reshape(B, S, V)


# ---------------------------------------------------------------------------
# Pure-JAX reference (correctness check)
# ---------------------------------------------------------------------------
def reference(x, params, eps=1e-12):
    h = x @ params["dense_w"] + params["dense_b"]
    h = 0.5 * h * (1.0 + lax.erf(h / jnp.sqrt(2.0)))
    mu = jnp.mean(h, axis=-1, keepdims=True)
    var = jnp.mean(jnp.square(h - mu), axis=-1, keepdims=True)
    h = (h - mu) / jnp.sqrt(var + eps)
    h = h * params["ln_g"] + params["ln_b"]
    return h @ params["dec_w"] + params["dec_bias"]


if __name__ == "__main__":
    # Small config consistent with the module: hidden_size=32, vocab_size=128
    B, S, H, V = 2, 8, 32, 128

    key = jax.random.PRNGKey(0)
    k_x, k_dw, k_db, k_decw = jax.random.split(key, 4)

    x = jax.random.normal(k_x, (B, S, H), dtype=jnp.float32)

    params = {
        # nn.Linear(H, H): weight stored pre-transposed to (in, out)
        "dense_w": jax.random.normal(k_dw, (H, H), dtype=jnp.float32) * 0.02,
        "dense_b": jax.random.normal(k_db, (1, H), dtype=jnp.float32) * 0.02,
        # nn.LayerNorm(H): gamma=1, beta=0 (PyTorch default init)
        "ln_g": jnp.ones((1, H), dtype=jnp.float32),
        "ln_b": jnp.zeros((1, H), dtype=jnp.float32),
        # nn.Linear(H, V, bias=False): weight pre-transposed to (in, out)
        "dec_w": jax.random.normal(k_decw, (H, V), dtype=jnp.float32) * 0.02,
        # self.bias = nn.Parameter(torch.zeros(vocab_size))
        "dec_bias": jnp.zeros((1, V), dtype=jnp.float32),
    }

    # f32 params + f32 logits for the demo so the f32-reference check is tight;
    # production: feed bf16 weights and out_dtype=jnp.bfloat16.
    out = bert_lm_prediction_head(x, params, out_dtype=jnp.float32)
    out = jax.block_until_ready(out)
    assert out.shape == (B, S, V)

    ref = reference(x, params)
    np.testing.assert_allclose(np.asarray(out), np.asarray(ref),
                               rtol=1e-4, atol=1e-4)

    print("KERNEL_OK")
</pallas_src>

<mosaic_0001>
module attributes {stable_mosaic.version = 11 : i64} {
  func.func @_fused_head_kernel(%arg0: i32, %arg1: i32, %arg2: memref<16x32xf32, #tpu.memory_space<vmem>>, %arg3: memref<32x32xf32, #tpu.memory_space<vmem>>, %arg4: memref<1x32xf32, #tpu.memory_space<vmem>>, %arg5: memref<1x32xf32, #tpu.memory_space<vmem>>, %arg6: memref<1x32xf32, #tpu.memory_space<vmem>>, %arg7: memref<32x128xf32, #tpu.memory_space<vmem>>, %arg8: memref<1x128xf32, #tpu.memory_space<vmem>>, %arg9: memref<16x128xf32, #tpu.memory_space<vmem>>, %arg10: memref<16x32xf32, #tpu.memory_space<vmem>>) attributes {dimension_semantics = [#tpu.dimension_semantics<parallel>, #tpu.dimension_semantics<arbitrary>], iteration_bounds = array<i64: 1, 1>, scalar_prefetch = 0 : i64, scratch_operands = 1 : i64, tpu.core_type = #tpu.core_type<tc>, window_params = [{transform_indices = @transform_0, window_bounds = array<i64: 16, 32>}, {pipeline_mode = #tpu.pipeline_mode<synchronous>, transform_indices = @transform_1, window_bounds = array<i64: 32, 32>}, {pipeline_mode = #tpu.pipeline_mode<synchronous>, transform_indices = @transform_2, window_bounds = array<i64: 1, 32>}, {pipeline_mode = #tpu.pipeline_mode<synchronous>, transform_indices = @transform_3, window_bounds = array<i64: 1, 32>}, {pipeline_mode = #tpu.pipeline_mode<synchronous>, transform_indices = @transform_4, window_bounds = array<i64: 1, 32>}, {transform_indices = @transform_5, window_bounds = array<i64: 32, 128>}, {transform_indices = @transform_6, window_bounds = array<i64: 1, 128>}, {transform_indices = @transform_7, window_bounds = array<i64: 16, 128>}]} {
    %c0_i32 = arith.constant 0 : i32
    %0 = arith.cmpi eq, %arg1, %c0_i32 : i32
    %1 = arith.extui %0 : i1 to i32
    %c0_i32_0 = arith.constant 0 : i32
    %2 = arith.cmpi ne, %1, %c0_i32_0 : i32
    scf.if %2 {
      %c0_8 = arith.constant 0 : index
      %c0_9 = arith.constant 0 : index
      %10 = vector.load %arg2[%c0_8, %c0_9] : memref<16x32xf32, #tpu.memory_space<vmem>>, vector<16x32xf32>
      %c0_10 = arith.constant 0 : index
      %c0_11 = arith.constant 0 : index
      %11 = vector.load %arg3[%c0_10, %c0_11] : memref<32x32xf32, #tpu.memory_space<vmem>>, vector<32x32xf32>
      %cst_12 = arith.constant dense<0.000000e+00> : vector<16x32xf32>
      %12 = tpu.matmul %10, %11, %cst_12 {dimension_numbers = #tpu.dot_dimension_numbers<[1], [0], [0], [1], [0, 0, 1, 1], [], []>} : vector<16x32xf32>, vector<32x32xf32>, vector<16x32xf32> -> vector<16x32xf32>
      %c0_13 = arith.constant 0 : index
      %c0_14 = arith.constant 0 : index
      %13 = vector.load %arg4[%c0_13, %c0_14] : memref<1x32xf32, #tpu.memory_space<vmem>>, vector<1x32xf32>
      %14 = vector.broadcast %13 : vector<1x32xf32> to vector<16x32xf32>
      %15 = arith.addf %12, %14 : vector<16x32xf32>
      %cst_15 = arith.constant 5.000000e-01 : f32
      %16 = vector.broadcast %cst_15 : f32 to vector<16x32xf32>
      %17 = arith.mulf %16, %15 : vector<16x32xf32>
      %cst_16 = arith.constant 0.707106769 : f32
      %18 = vector.broadcast %cst_16 : f32 to vector<16x32xf32>
      %19 = arith.mulf %15, %18 : vector<16x32xf32>
      %20 = math.erf %19 : vector<16x32xf32>
      %cst_17 = arith.constant 1.000000e+00 : f32
      %21 = vector.broadcast %cst_17 : f32 to vector<16x32xf32>
      %22 = arith.addf %21, %20 : vector<16x32xf32>
      %23 = arith.mulf %17, %22 : vector<16x32xf32>
      %cst_18 = arith.constant dense<0.000000e+00> : vector<16xf32>
      %24 = vector.multi_reduction <add>, %23, %cst_18 [1] : vector<16x32xf32> to vector<16xf32>
      %25 = vector.shape_cast %24 : vector<16xf32> to vector<16x1xf32>
      %cst_19 = arith.constant 3.200000e+01 : f32
      %26 = vector.broadcast %cst_19 : f32 to vector<16x1xf32>
      %27 = arith.divf %25, %26 : vector<16x1xf32>
      %28 = vector.broadcast %27 : vector<16x1xf32> to vector<16x32xf32>
      %29 = arith.subf %23, %28 : vector<16x32xf32>
      %30 = arith.mulf %29, %29 : vector<16x32xf32>
      %cst_20 = arith.constant dense<0.000000e+00> : vector<16xf32>
      %31 = vector.multi_reduction <add>, %30, %cst_20 [1] : vector<16x32xf32> to vector<16xf32>
      %32 = vector.shape_cast %31 : vector<16xf32> to vector<16x1xf32>
      %cst_21 = arith.constant 3.200000e+01 : f32
      %33 = vector.broadcast %cst_21 : f32 to vector<16x1xf32>
      %34 = arith.divf %32, %33 : vector<16x1xf32>
      %35 = vector.broadcast %27 : vector<16x1xf32> to vector<16x32xf32>
      %36 = arith.subf %23, %35 : vector<16x32xf32>
      %cst_22 = arith.constant 9.99999996E-13 : f32
      %37 = vector.broadcast %cst_22 : f32 to vector<16x1xf32>
      %38 = arith.addf %34, %37 : vector<16x1xf32>
      %39 = math.rsqrt %38 : vector<16x1xf32>
      %40 = vector.broadcast %39 : vector<16x1xf32> to vector<16x32xf32>
      %41 = arith.mulf %36, %40 : vector<16x32xf32>
      %c0_23 = arith.constant 0 : index
      %c0_24 = arith.constant 0 : index
      %42 = vector.load %arg5[%c0_23, %c0_24] : memref<1x32xf32, #tpu.memory_space<vmem>>, vector<1x32xf32>
      %43 = vector.broadcast %42 : vector<1x32xf32> to vector<16x32xf32>
      %44 = arith.mulf %41, %43 : vector<16x32xf32>
      %c0_25 = arith.constant 0 : index
      %c0_26 = arith.constant 0 : index
      %45 = vector.load %arg6[%c0_25, %c0_26] : memref<1x32xf32, #tpu.memory_space<vmem>>, vector<1x32xf32>
      %46 = vector.broadcast %45 : vector<1x32xf32> to vector<16x32xf32>
      %47 = arith.addf %44, %46 : vector<16x32xf32>
      %c0_27 = arith.constant 0 : index
      %c0_28 = arith.constant 0 : index
      %48 = vector.load %arg10[%c0_27, %c0_28] : memref<16x32xf32, #tpu.memory_space<vmem>>, vector<16x32xf32>
      tpu.vector_store %arg10[%c0_27, %c0_28], %47 {strides = array<i32>} : memref<16x32xf32, #tpu.memory_space<vmem>>, vector<16x32xf32>,
    } else {
    }
    %c0 = arith.constant 0 : index
    %c0_1 = arith.constant 0 : index
    %3 = vector.load %arg10[%c0, %c0_1] : memref<16x32xf32, #tpu.memory_space<vmem>>, vector<16x32xf32>
    %c0_2 = arith.constant 0 : index
    %c0_3 = arith.constant 0 : index
    %4 = vector.load %arg7[%c0_2, %c0_3] : memref<32x128xf32, #tpu.memory_space<vmem>>, vector<32x128xf32>
    %cst = arith.constant dense<0.000000e+00> : vector<16x128xf32>
    %5 = tpu.matmul %3, %4, %cst {dimension_numbers = #tpu.dot_dimension_numbers<[1], [0], [0], [1], [0, 0, 1, 1], [], []>} : vector<16x32xf32>, vector<32x128xf32>, vector<16x128xf32> -> vector<16x128xf32>
    %c0_4 = arith.constant 0 : index
    %c0_5 = arith.constant 0 : index
    %6 = vector.load %arg8[%c0_4, %c0_5] : memref<1x128xf32, #tpu.memory_space<vmem>>, vector<1x128xf32>
    %7 = vector.broadcast %6 : vector<1x128xf32> to vector<16x128xf32>
    %8 = arith.addf %5, %7 : vector<16x128xf32>
    %c0_6 = arith.constant 0 : index
    %c0_7 = arith.constant 0 : index
    %9 = vector.load %arg9[%c0_6, %c0_7] : memref<16x128xf32, #tpu.memory_space<vmem>>, vector<16x128xf32>
    tpu.vector_store %arg9[%c0_6, %c0_7], %8 {strides = array<i32>} : memref<16x128xf32, #tpu.memory_space<vmem>>, vector<16x128xf32>,
    return
  }
  func.func @transform_0(%arg0: i32, %arg1: i32) -> (i32, i32) {
    %c0_i32 = arith.constant 0 : i32
    %c0_i32_0 = arith.constant 0 : i32
    return %arg0, %c0_i32 : i32, i32
  }
  func.func @transform_1(%arg0: i32, %arg1: i32) -> (i32, i32) {
    %c0_i32 = arith.constant 0 : i32
    %c0_i32_0 = arith.constant 0 : i32
    %c0_i32_1 = arith.constant 0 : i32
    return %c0_i32, %c0_i32_0 : i32, i32
  }
  func.func @transform_2(%arg0: i32, %arg1: i32) -> (i32, i32) {
    %c0_i32 = arith.constant 0 : i32
    %c0_i32_0 = arith.constant 0 : i32
    %c0_i32_1 = arith.constant 0 : i32
    return %c0_i32, %c0_i32_0 : i32, i32
  }
  func.func @transform_3(%arg0: i32, %arg1: i32) -> (i32, i32) {
    %c0_i32 = arith.constant 0 : i32
    %c0_i32_0 = arith.constant 0 : i32
    %c0_i32_1 = arith.constant 0 : i32
    return %c0_i32, %c0_i32_0 : i32, i32
  }
  func.func @transform_4(%arg0: i32, %arg1: i32) -> (i32, i32) {
    %c0_i32 = arith.constant 0 : i32
    %c0_i32_0 = arith.constant 0 : i32
    %c0_i32_1 = arith.constant 0 : i32
    return %c0_i32, %c0_i32_0 : i32, i32
  }
  func.func @transform_5(%arg0: i32, %arg1: i32) -> (i32, i32) {
    %c0_i32 = arith.constant 0 : i32
    %c0_i32_0 = arith.constant 0 : i32
    return %c0_i32, %arg1 : i32, i32
  }
  func.func @transform_6(%arg0: i32, %arg1: i32) -> (i32, i32) {
    %c0_i32 = arith.constant 0 : i32
    %c0_i32_0 = arith.constant 0 : i32
    return %c0_i32, %arg1 : i32, i32
  }
  func.func @transform_7(%arg0: i32, %arg1: i32) -> (i32, i32) {
    %c0_i32 = arith.constant 0 : i32
    return %arg0, %arg1 : i32, i32
  }
}

</mosaic_0001>

<bundles_post_ra>
// kernel: tpu_custom_call.1
= control target key start
LH: loop header
LB: loop body
LE: loop exit
PB: predicated region body
PF: predicated region fallthrough
CT: control target
= control target key end

     0   :  { %12 = vsyncpa [#allocation4], 0  ;;  %s581_s0 = inlined_call_operand.hbm [shape: f32[16,32], index: 0, kind: input, shape index: {}]   ;;  %s582_s1 = inlined_call_operand.hbm [shape: f32[32,32], index: 1, kind: input, shape index: {}]   ;;  %s583_s2 = inlined_call_operand.vmem [shape: f32[1,32], index: 2, kind: input, shape index: {}]   ;;  %s584_s3 = inlined_call_operand.vmem [shape: f32[1,32], index: 3, kind: input, shape index: {}]   ;;  %s585_s4 = inlined_call_operand.vmem [shape: f32[1,32], index: 4, kind: input, shape index: {}]   ;;  %s586_s5 = inlined_call_operand.hbm [shape: f32[32,128], index: 5, kind: input, shape index: {}]   ;;  %s587_s6 = inlined_call_operand.vmem [shape: f32[1,128], index: 6, kind: input, shape index: {}]   ;;  %s588_s7 = inlined_call_operand.hbm [shape: f32[16,128], index: 7, kind: output, shape index: {}]  }
   0x1   :  { %13 = vsyncpa [#allocation7], 0 }
   0x2   :  { %14 = vsyncpa [#allocation5], 0  ;;  %s32_s26 = sshll.u32 %s582_s1, 4  ;;  %s470_s27 = smov [#allocation6]   ;;  %s33_s26 = int_to_ptr.hbm [resolvable:$true] %s32_s26 }
   0x3   :  { %s34_s28 = sshll.u32 %s470_s27, 4  ;;  %s19_s8 = sshll.u32 %s581_s0, 4  ;;  %s35_s28 = int_to_ptr.vmem [resolvable:$true] %s34_s28  ;;  %s20_s8 = int_to_ptr.hbm [resolvable:$true] %s19_s8 }
   0x4   :  { %s471_s9 = smov 128   ;;  %s472_s10 = smov 8  }
   0x5   :  { %40 = dma.hbm_to_vmem [thread:$0]  %s33_s26, 512, %s35_s28, [#allocation7], %s471_s9, %s471_s9, %s472_s10  }
   0x6   :  { %s473_s11 = smov [#allocation3]   ;;  %s51_s1 = sshll.u32 %s586_s5, 4  ;;  %s52_s1 = int_to_ptr.hbm [resolvable:$true] %s51_s1 }
   0x7   :  { %s21_s12 = sshll.u32 %s473_s11, 4  ;;  %s474_s0 = smov [#allocation8]   ;;  %s22_s12 = int_to_ptr.vmem [resolvable:$true] %s21_s12 }
   0x8   :  { %27 = dma.hbm_to_vmem [thread:$0]  %s20_s8, 256, %s22_s12, [#allocation4], %s471_s9, %s471_s9, %s472_s10  }
   0x9   :  { %s53_s15 = sshll.u32 %s474_s0, 4  ;;  %s54_s15 = int_to_ptr.vmem [resolvable:$true] %s53_s15 }
   0xa   :  { %59 = dma.hbm_to_vmem [thread:$0]  %s52_s1, 512, %s54_s15, [#allocation7], %s471_s9, %s471_s9, %s472_s10  }
   0xb   :  { %464 = dma.done.wait [#allocation4], 256  }
   0xc   :  { %465 = vsyncadd [#allocation4], 4294967040 }
   0xd   :  { %466 = dma.done.wait [#allocation7], 1024  }
   0xe   :  { %467 = vsyncadd [#allocation7], 4294966272  ;;  %v83_v0 = vld [vmem:[#allocation6 + $0x18] sm:$0xff]  ;;  %v82_v1 = vld [vmem:[#allocation6 + $0x10] sm:$0xff]  ;;  %vm88_vm0 = vcmask 261120   ;;  %s476_s20 = smov [#allocation9]  }
   0xf   :  { %107 = vmatpush.msra.mxu0 %v83_v0  ;;  %339 = vmatpush.msra.mxu2 %v83_v0  ;;  %v81_v2 = vld [vmem:[#allocation6 + $0x8] sm:$0xff]  ;;  %v80_v3 = vld [vmem:[#allocation6] sm:$0xff]  ;;  %v78_v4 = vld [vmem:[#allocation3] sm:$0xff]  ;;  %s317_s21 = sshll.u32 %s476_s20, 4  ;;  %s319_s24 = sshll.u32 %s588_s7, 4  ;;  %s318_s21 = int_to_ptr.vmem [resolvable:$true] %s317_s21  ;;  %s320_s24 = int_to_ptr.hbm [resolvable:$true] %s319_s24 }
  0x10   :  { %v79_v5 = vld [vmem:[#allocation3 + $0x8] sm:$0xff]  ;;  %v354_v6 = vld [vmem:[%s583_s2] ss:$0 sm:$0xff] }
  0x11   :  { %108 = vmatpush.msra.mxu0 %v82_v1  ;;  %340 = vmatpush.msra.mxu2 %v82_v1 }
  0x13   :  { %109 = vmatpush.msra.mxu0 %v81_v2  ;;  %341 = vmatpush.msra.mxu2 %v81_v2 }
  0x15   :  { %110 = vmatpush.msra.mxu0 %v80_v3  ;;  %342 = vmatpush.msra.mxu2 %v80_v3 }
  0x16   :  { %333 = vmatmul.msk.f32.vlgmr.msra.gmra.mxu0 %vm88_vm0, %v78_v4  ;;  %334 = vmatmul.msk.f32.vlgmr.msra.gmra.mxu2 %vm88_vm0, %v79_v5 }
  0x93   :  { %v112_v7 = vpop.f32.mrf.mxu0 }
  0x94   :  { %v540_v8 = vadd.f32 %v354_v6, %v112_v7 }
  0x96   :  { %v543_v9 = vmul.f32 0.70710677, %v540_v8 }
  0x98   :  { %v122_v10 = vmul.f32 %v543_v9, %v543_v9 }
  0x99   :  { %v115_v11 = vpop.f32.mrf.mxu2 }
  0x9a   :  { %v123_v12 = vmin.f32 %v122_v10, 16.0  ;;  %v547_v13 = vadd.f32 %v354_v6, %v115_v11 }
  0x9c   :  { %v124_v14 = vmul.f32 2.1237322e-06, %v123_v12  ;;  %v550_v15 = vmul.f32 0.70710677, %v547_v13  ;;  %v135_v16 = vmul.f32 3.8918573e-05, %v123_v12 }
  0x9e   :  { %v162_v17 = vmul.f32 %v550_v15, %v550_v15  ;;  %v136_v18 = vadd.f32 0.001143296, %v135_v16  ;;  %v125_v19 = vadd.f32 0.00028619796, %v124_v14 }
  0xa0   :  { %v163_v20 = vmin.f32 %v162_v17, 16.0  ;;  %v137_v21 = vmul.f32 %v136_v18, %v123_v12  ;;  %v126_v25 = vmul.f32 %v125_v19, %v123_v12 }
  0xa2   :  { %v164_v22 = vmul.f32 2.1237322e-06, %v163_v20  ;;  %v175_v23 = vmul.f32 3.8918573e-05, %v163_v20  ;;  %v138_v24 = vadd.f32 0.014752088, %v137_v21 }
  0xa3   :  { %v127_v32 = vadd.f32 0.0036580483, %v126_v25 }
  0xa4   :  { %v165_v26 = vadd.f32 0.00028619796, %v164_v22  ;;  %v176_v27 = vadd.f32 0.001143296, %v175_v23  ;;  %v139_v28 = vmul.f32 %v138_v24, %v123_v12  ;;  %v119_v22 = vmul.f32 0.5, %v547_v13 }
  0xa5   :  { %v128_v38 = vmul.f32 %v127_v32, %v123_v12 }
  0xa6   :  { %v166_v29 = vmul.f32 %v165_v26, %v163_v20  ;;  %v177_v30 = vmul.f32 %v176_v27, %v163_v20  ;;  %v140_v31 = vadd.f32 0.112945676, %v139_v28  ;;  %v118_v28 = vmul.f32 0.5, %v540_v8 }
  0xa7   :  { %v129_v44 = vadd.f32 0.05243302, %v128_v38 }
  0xa8   :  { %v167_v33 = vadd.f32 0.0036580483, %v166_v29  ;;  %v178_v34 = vadd.f32 0.014752088, %v177_v30  ;;  %v141_v35 = vmul.f32 %v140_v31, %v123_v12  ;;  %v475_v29 = vmov 32.0  }
  0xa9   :  { %v130_v48 = vmul.f32 %v129_v44, %v123_v12  ;;  %v276_v44 = vld [vmem:[#allocation8 + $0x18] sm:$0xff] }
  0xaa   :  { %v179_v36 = vmul.f32 %v178_v34, %v163_v20  ;;  %v142_v37 = vadd.f32 0.4994258, %v141_v35  ;;  %v168_v39 = vmul.f32 %v167_v33, %v163_v20  ;;  %343 = vmatpush.msra.mxu3 %v276_v44  ;;  %300 = vmatpush.msra.mxu1 %v276_v44 }
  0xab   :  { %v131_v52 = vadd.f32 0.18741608, %v130_v48  ;;  %v274_v48 = vld [vmem:[#allocation8 + $0x8] sm:$0xff] }
  0xac   :  { %v180_v40 = vadd.f32 0.112945676, %v179_v36  ;;  %v143_v41 = vmul.f32 %v142_v37, %v123_v12  ;;  %v169_v45 = vadd.f32 0.05243302, %v168_v39 }
  0xad   :  { %v132_v57 = vmul.f32 %v131_v52, %v123_v12 }
  0xae   :  { %v181_v42 = vmul.f32 %v180_v40, %v163_v20  ;;  %v144_v43 = vadd.f32 1.0, %v143_v41  ;;  %v170_v49 = vmul.f32 %v169_v45, %v163_v20 }
  0xaf   :  { %v133_v1 = vadd.f32 1.1283791, %v132_v57 }
  0xb0   :  { %v182_v46 = vadd.f32 0.4994258, %v181_v42  ;;  %358 = vrcp.f32 %v144_v43  ;;  %v171_v53 = vadd.f32 0.18741608, %v170_v49  ;;  %v156_v62 = vand.u32 2147483648, %v144_v43 }
  0xb1   :  { %vm150_vm2 = vweird.f32 %v144_v43  ;;  %v154_v0 = vand.u32 2147483647, %v144_v43  ;;  %v134_v14 = vmul.f32 %v133_v1, %v543_v9  ;;  %v356_v1 = vld [vmem:[%s585_s4] ss:$0 sm:$0xff] }
  0xb2   :  { %v183_v47 = vmul.f32 %v182_v46, %v163_v20  ;;  %v172_v58 = vmul.f32 %v171_v53, %v163_v20  ;;  %v157_v7 = vor.u32 1.1754944e-38, %v156_v62  ;;  %v275_v46 = vld [vmem:[#allocation8 + $0x10] sm:$0xff]  ;;  %v355_v62 = vld [vmem:[%s584_s3] ss:$0 sm:$0xff] }
  0xb3   :  { %vm155_vm6 = vcmp.eq.f32.partialorder %v154_v0, 8.507059e+37  ;;  %344 = vmatpush.msra.mxu3 %v275_v46  ;;  %301 = vmatpush.msra.mxu1 %v275_v46 }
  0xb4   :  { %v184_v50 = vadd.f32 1.0, %v183_v47  ;;  %v173_v2 = vadd.f32 1.1283791, %v172_v58 }
  0xb5   :  { %345 = vmatpush.msra.mxu3 %v274_v48  ;;  %302 = vmatpush.msra.mxu1 %v274_v48 }
  0xb6   :  { %360 = vrcp.f32 %v184_v50  ;;  %v359_v51 = vpop.eup %358  ;;  %v196_v3 = vand.u32 2147483648, %v184_v50  ;;  %v194_v5 = vand.u32 2147483647, %v184_v50  ;;  %vm190_vm5 = vweird.f32 %v184_v50 }
  0xb7   :  { %v146_v54 = vmul.f32 %v359_v51, %v144_v43  ;;  %vm151_vm1 = vweird.f32 %v359_v51  ;;  %v174_v16 = vmul.f32 %v173_v2, %v550_v15  ;;  %362 = vrcp.f32 %v475_v29 }
  0xb8   :  { %vm152_vm3 = vmor %vm150_vm2, %vm151_vm1  ;;  %v197_v11 = vor.u32 1.1754944e-38, %v196_v3  ;;  %vm195_vm8 = vcmp.eq.f32.partialorder %v194_v5, 8.507059e+37 }
  0xb9   :  { %v147_v55 = vsub.f32 1.0, %v146_v54 }
  0xbb   :  { %v148_v59 = vmul.f32 %v359_v51, %v147_v55 }
  0xbc   :  { %v361_v56 = vpop.eup %360 }
  0xbd   :  { %v186_v60 = vmul.f32 %v361_v56, %v184_v50  ;;  %v149_v61 = vadd.f32 %v359_v51, %v148_v59  ;;  %vm191_vm4 = vweird.f32 %v361_v56  ;;  %v363_v30 = vpop.eup %362  ;;  %v273_v50 = vld [vmem:[#allocation8] sm:$0xff] }
  0xbe   :  { %vm192_vm7 = vmor %vm190_vm5, %vm191_vm4  ;;  %v213_v31 = vmul.f32 32.0, %v363_v30  ;;  %vm217_vm9 = vweird.f32 %v363_v30  ;;  %346 = vmatpush.msra.mxu3 %v273_v50  ;;  %303 = vmatpush.msra.mxu1 %v273_v50 }
  0xbf   :  { %v187_v63 = vsub.f32 1.0, %v186_v60  ;;  %v153_v6 = vsel %vm152_vm3, %v359_v51, %v149_v61 }
  0xc0   :  { %v158_v12 = vsel %vm155_vm6, %v157_v7, %v153_v6  ;;  %v214_v32 = vsub.f32 1.0, %v213_v31 }
  0xc1   :  { %v188_v4 = vmul.f32 %v361_v56, %v187_v63  ;;  %v159_v20 = vmul.f32 %v158_v12, %v134_v14 }
  0xc2   :  { %v215_v33 = vmul.f32 %v363_v30, %v214_v32 }
  0xc3   :  { %v189_v10 = vadd.f32 %v361_v56, %v188_v4  ;;  %v335_v24 = vclamps-f32 %v159_v20, 1.0 }
  0xc4   :  { %v216_v13 = vadd.f32 %v363_v30, %v215_v33 }
  0xc5   :  { %v193_v17 = vsel %vm192_vm7, %v361_v56, %v189_v10  ;;  %v202_v27 = vadd.f32 1.0, %v335_v24 }
  0xc6   :  { %v198_v18 = vsel %vm195_vm8, %v197_v11, %v193_v17  ;;  %v218_v34 = vsel %vm217_vm9, %v363_v30, %v216_v13 }
  0xc7   :  { %v199_v19 = vmul.f32 %v198_v18, %v174_v16  ;;  %v204_v9 = vmul.f32 %v202_v27, %v118_v28  ;;  %v357_v18 = vld [vmem:[%s587_s6] ss:$0 sm:$0xff] }
  0xc9   :  { %v336_v21 = vclamps-f32 %v199_v19, 1.0  ;;  %v206_v15 = vsel %vm88_vm0, %v204_v9, 0.0 }
  0xcb   :  { %v203_v23 = vadd.f32 1.0, %v336_v21 }
  0xcd   :  { %v205_v25 = vmul.f32 %v203_v23, %v119_v22 }
  0xcf   :  { %v209_v26 = vsel %vm88_vm0, %v205_v25, 0.0 }
  0xd0   :  { %210 = vadd.xlane.f32.xlu0 %v209_v26 }
  0xd8   :  { %207 = vadd.xlane.f32.xlu0 %v206_v15 }
 0x143   :  { %v211_v35 = vpop.xlane.xlu0 %210 }
 0x144   :  { %v220_v36 = vmul.f32 %v218_v34, %v211_v35 }
 0x146   :  { %v222_v37 = vsub.f32 %v205_v25, %v220_v36 }
 0x148   :  { %v224_v38 = vmul.f32 %v222_v37, %v222_v37 }
 0x14a   :  { %v228_v39 = vsel %vm88_vm0, %v224_v38, 0.0 }
 0x14b   :  { %229 = vadd.xlane.f32.xlu1 %v228_v39  ;;  %v208_v8 = vpop.xlane.xlu0 %207 }
 0x14c   :  { %v219_v40 = vmul.f32 %v218_v34, %v208_v8 }
 0x14e   :  { %v221_v41 = vsub.f32 %v204_v9, %v219_v40 }
 0x150   :  { %v223_v42 = vmul.f32 %v221_v41, %v221_v41 }
 0x152   :  { %v225_v43 = vsel %vm88_vm0, %v223_v42, 0.0 }
 0x153   :  { %226 = vadd.xlane.f32.xlu1 %v225_v43 }
 0x1be   :  { %v230_v45 = vpop.xlane.xlu1 %229 }
 0x1bf   :  { %v232_v47 = vmul.f32 %v230_v45, %v218_v34 }
 0x1c1   :  { %v234_v49 = vadd.f32 1e-12, %v232_v47 }
 0x1c3   :  { %364 = vrsqrt.f32 %v234_v49  ;;  %vm251_vm11 = vweird.f32 %v234_v49 }
 0x1c6   :  { %v227_v51 = vpop.xlane.xlu1 %226 }
 0x1c7   :  { %v231_v52 = vmul.f32 %v227_v51, %v218_v34 }
 0x1c9   :  { %v365_v53 = vpop.eup %364  ;;  %v233_v54 = vadd.f32 1e-12, %v231_v52 }
 0x1ca   :  { %v246_v55 = vmul.f32 %v365_v53, %v234_v49  ;;  %vm252_vm10 = vweird.f32 %v365_v53 }
 0x1cb   :  { %366 = vrsqrt.f32 %v233_v54  ;;  %vm253_vm12 = vmor %vm251_vm11, %vm252_vm10  ;;  %vm241_vm14 = vweird.f32 %v233_v54 }
 0x1cc   :  { %v247_v56 = vmul.f32 %v365_v53, %v246_v55 }
 0x1ce   :  { %v248_v57 = vmul.f32 0.5, %v247_v56 }
 0x1d0   :  { %v249_v58 = vsub.f32 1.5, %v248_v57 }
 0x1d1   :  { %v367_v59 = vpop.eup %366 }
 0x1d2   :  { %v250_v60 = vmul.f32 %v365_v53, %v249_v58  ;;  %v236_v61 = vmul.f32 %v367_v59, %v233_v54  ;;  %vm242_vm13 = vweird.f32 %v367_v59 }
 0x1d3   :  { %vm243_vm15 = vmor %vm241_vm14, %vm242_vm13 }
 0x1d4   :  { %v254_v63 = vsel %vm253_vm12, %v365_v53, %v250_v60  ;;  %v237_v0 = vmul.f32 %v367_v59, %v236_v61 }
 0x1d5   :  { %v256_v2 = vmul.f32 %v254_v63, %v222_v37 }
 0x1d6   :  { %v238_v3 = vmul.f32 0.5, %v237_v0 }
 0x1d7   :  { %v262_v4 = vmul.f32 %v355_v62, %v256_v2 }
 0x1d8   :  { %v239_v5 = vsub.f32 1.5, %v238_v3 }
 0x1d9   :  { %v268_v6 = vadd.f32 %v356_v1, %v262_v4 }
 0x1da   :  { %v240_v7 = vmul.f32 %v367_v59, %v239_v5 }
 0x1db   :  { %270 = vst.msk [vmem:[#allocation2 + $0x8] sm:$0xff] %vm88_vm0, %v268_v6 }
 0x1dc   :  { %v244_v10 = vsel %vm243_vm15, %v367_v59, %v240_v7 }
 0x1dd   :  { %v255_v11 = vmul.f32 %v244_v10, %v221_v41 }
 0x1df   :  { %v261_v12 = vmul.f32 %v355_v62, %v255_v11 }
 0x1e1   :  { %v267_v14 = vadd.f32 %v356_v1, %v261_v12 }
 0x1e2   :  { %v272_v16 = vld [vmem:[#allocation2 + $0x8] sm:$0xff] }
 0x1e3   :  { %269 = vst.msk [vmem:[#allocation2] sm:$0xff] %vm88_vm0, %v267_v14  ;;  %338 = vmatmul.msk.f32.vlgmr.msra.gmra.mxu3 %vm88_vm0, %v272_v16 }
 0x1ea   :  { %v271_v17 = vld [vmem:[#allocation2] sm:$0xff] }
 0x1eb   :  { %337 = vmatmul.msk.f32.vlgmr.msra.gmra.mxu1 %vm88_vm0, %v271_v17 }
 0x266   :  { %v308_v19 = vpop.f32.mrf.mxu3 }
 0x267   :  { %v309_v20 = vadd.f32 %v357_v18, %v308_v19 }
 0x268   :  { %v305_v21 = vpop.f32.mrf.mxu1 }
 0x269   :  { %312 = vst [vmem:[#allocation9 + $0x8] sm:$0xff] %v309_v20  ;;  %v306_v22 = vadd.f32 %v357_v18, %v305_v21 }
 0x26b   :  { %311 = vst [vmem:[#allocation9] sm:$0xff] %v306_v22 }
 0x26c   :  { %325 = dma.vmem_to_hbm [thread:$0]  %s318_s21, 256, %s320_s24, [#allocation5], %s471_s9, %s471_s9, %s472_s10  }
 0x26d   :  { %468 = dma.done.wait [#allocation5], 256  }
 0x26e   :  { %469 = vsyncadd [#allocation5], 4294967040 }
 0x26f   :  { %330 = vsyncpa [#allocation4], 1 }
 0x270   :  { %331 = vsyncpa [#allocation7], 1 }
 0x271   :  { %332 = vsyncpa [#allocation5], 1 }

</bundles_post_ra>
